<compile_context>
chip_gen: v5e
topology: v5e:2x2
jax: 0.10.0
libtpu: 0.0.40
codegen_flags: <defaults>
</compile_context>

<pallas_src>
import jax
import jax.numpy as jnp
from jax.experimental import pallas as pl
from jax.experimental.pallas import tpu as pltpu


def cls_head_kernel(x_ref, pool_ref, w_ref, b_ref, o_ref, acc_ref):
    """One (clip, split, C-chunk) grid step.

    x_ref:    (C_CHUNK, T*HW)  activation slab, native layout / native dtype.
    pool_ref: (T*HW, T)        0/1 sum-pooling matrix, x dtype (exact in bf16).
    w_ref:    (C_CHUNK, Kp)    fc_cls weight chunk, transposed, pre-scaled by 1/HW, f32.
    b_ref:    (1, Kp)          bias row for this split (zeros for splits > 0), f32.
    o_ref:    (T, Kp)          f32 (partial) logits for this (clip, split).
    acc_ref:  (T, Kp)          f32 VMEM accumulator, live across the chunk axis.
    """
    c = pl.program_id(2)

    @pl.when(c == 0)
    def _():
        acc_ref[...] = jnp.zeros_like(acc_ref)

    # Spatial sum-pool on the MXU: (C_CHUNK, T*HW) @ (T*HW, T) -> (C_CHUNK, T), f32 acc.
    pooled = jnp.dot(x_ref[...], pool_ref[...], preferred_element_type=jnp.float32)
    # Partial C contraction (transposed LHS): (C_CHUNK, T) x (C_CHUNK, Kp) -> (T, Kp).
    acc_ref[...] += jax.lax.dot_general(
        pooled, w_ref[...],
        dimension_numbers=(((0,), (0,)), ((), ())),
        preferred_element_type=jnp.float32)

    # TODO(synk): training-mode dropout on the pooled features is not modeled (eval path).
    @pl.when(c == pl.num_programs(2) - 1)
    def _():
        o_ref[...] = acc_ref[...] + b_ref[...]      # lane-dense unmasked store


def _choose_c_chunk(C, max_chunk=256):
    """Largest divisor of C that is <= max_chunk and a multiple of 8 (or C itself)."""
    if C <= max_chunk:
        return C
    for cand in range(max_chunk, 7, -1):
        if C % cand == 0 and cand % 8 == 0:
            return cand
    return C  # no suitable divisor: single big chunk (still correct, just less pipelined)


def cls_head_forward_batched(x, weight, bias, *, c_chunk=None, num_splits=None):
    """Batched head: x (B, C, T, H, W) any float dtype (bf16 recommended end-to-end);
    weight (K, C); bias (K,).  Returns (B, T, K) float32 classification scores."""
    B, C, T, H, W = x.shape
    K = weight.shape[0]
    HW = H * W
    THW = T * HW
    Kp = 128 * pl.cdiv(K, 128)                     # lane-dense padded output width

    if c_chunk is None:
        c_chunk = _choose_c_chunk(C)
    assert C % c_chunk == 0 and (c_chunk % 8 == 0 or c_chunk == C)
    num_chunks = C // c_chunk

    if num_splits is None:
        # Split the C range two ways for single-clip calls so both v7x TCs stream data.
        num_splits = 2 if (B == 1 and num_chunks % 2 == 0) else 1
    assert num_chunks % num_splits == 0
    cps = num_chunks // num_splits                 # chunks per split

    # Native-layout reshape only (contiguous, free): lane axis becomes T*HW.
    x_flat = x.reshape(B, C, THW)

    # Tiny invariant operands, prepared once wrapper-side.
    # 0/1 sum-pooling matrix P[t*HW + hw, t] = 1 in the activation dtype (exact in bf16).
    pool = (jnp.arange(THW, dtype=jnp.int32)[:, None] // HW
            == jnp.arange(T, dtype=jnp.int32)[None, :]).astype(x.dtype)
    # fc weight: transpose, fold the 1/HW mean scale, pad K -> Kp, keep f32 (tiny).
    w_scaled = jnp.pad(jnp.transpose(weight).astype(jnp.float32) / HW,
                       ((0, 0), (0, Kp - K)))
    # Bias rows per split: only split 0 carries the real bias (others are zero).
    b_rows = jnp.zeros((num_splits, 1, Kp), jnp.float32).at[0, 0, :K].set(
        bias.astype(jnp.float32))

    out = pl.pallas_call(
        cls_head_kernel,
        out_shape=jax.ShapeDtypeStruct((B, num_splits, T, Kp), jnp.float32),
        grid_spec=pltpu.PrefetchScalarGridSpec(
            num_scalar_prefetch=0,
            grid=(B, num_splits, cps),             # reduction (chunk) axis last
            in_specs=[
                pl.BlockSpec((None, c_chunk, THW), lambda b, s, c: (b, s * cps + c, 0)),
                pl.BlockSpec((THW, T),             lambda b, s, c: (0, 0)),
                pl.BlockSpec((c_chunk, Kp),        lambda b, s, c: (s * cps + c, 0)),
                pl.BlockSpec((None, 1, Kp),        lambda b, s, c: (s, 0, 0)),
            ],
            out_specs=pl.BlockSpec((None, None, T, Kp), lambda b, s, c: (b, s, 0, 0)),
            scratch_shapes=[pltpu.VMEM((T, Kp), jnp.float32)],
        ),
        compiler_params=pltpu.CompilerParams(
            dimension_semantics=("parallel", "parallel", "arbitrary"),
            # Post-chunking buffers total a few MB at real I3D shapes; 32 MiB leaves
            # ample headroom and is portable to v7x's 64 MiB physical VMEM.
            vmem_limit_bytes=32 * 1024 * 1024,
        ),
    )(x_flat, pool, w_scaled, b_rows)

    # Combine the per-split partial logits (tiny XLA add) and strip lane padding.
    out = out.sum(axis=1) if num_splits > 1 else out[:, 0]
    return out[:, :, :K]


def cls_head_forward(x, weight, bias, **kwargs):
    """ClsHead.forward for a single clip: x (1, C, T, H, W) -> (T, K)."""
    assert x.ndim == 5 and x.shape[0] == 1, "ClsHead expects a single clip (1, C, T, H, W)"
    return cls_head_forward_batched(x, weight, bias, **kwargs)[0]


if __name__ == "__main__":
    num_classes = 10
    B, C, T, H, W = 4, 32, 8, 16, 16

    key = jax.random.PRNGKey(0)
    kx, kw, kx2, kw2 = jax.random.split(key, 4)
    xb = jax.random.normal(kx, (B, C, T, H, W), dtype=jnp.float32)
    # normal_init(fc_cls, std=init_std=0.01, bias=0)
    weight = 0.01 * jax.random.normal(kw, (num_classes, C), dtype=jnp.float32)
    bias = jnp.zeros((num_classes,), dtype=jnp.float32)

    # --- batched clips, f32 activations ---
    out_b = jax.block_until_ready(cls_head_forward_batched(xb, weight, bias))
    ref_pool = jnp.mean(xb, axis=(3, 4))                                  # (B, C, T)
    ref_b = jnp.einsum("bct,kc->btk", ref_pool, weight) + bias            # (B, T, K)
    assert out_b.shape == (B, T, num_classes)
    assert jnp.allclose(out_b, ref_b, atol=1e-5, rtol=1e-5)

    # --- module-spec path: single clip (1, C, T, H, W) -> (T, K) ---
    out_1 = jax.block_until_ready(cls_head_forward(xb[:1], weight, bias))
    assert out_1.shape == (T, num_classes)
    assert jnp.allclose(out_1, ref_b[0], atol=1e-5, rtol=1e-5)

    # --- bf16 activations, single clip: multi-chunk C reduction + two-way C split
    #     (exercises the grid reduction axis and the v7x dual-TC split path) ---
    C2, T2, H2, W2 = 64, 8, 8, 8
    x2 = jax.random.normal(kx2, (1, C2, T2, H2, W2), dtype=jnp.bfloat16)
    w2 = 0.01 * jax.random.normal(kw2, (num_classes, C2), dtype=jnp.float32)
    b2 = 0.1 + jnp.zeros((num_classes,), dtype=jnp.float32)
    out_2 = jax.block_until_ready(cls_head_forward_batched(x2, w2, b2, c_chunk=16))
    ref_pool2 = jnp.mean(x2.astype(jnp.float32), axis=(3, 4))
    ref_2 = jnp.einsum("bct,kc->btk", ref_pool2, w2) + b2
    assert out_2.shape == (1, T2, num_classes)
    assert jnp.allclose(out_2, ref_2, atol=1e-4, rtol=1e-4)

    print("KERNEL_OK")
</pallas_src>

<mosaic_0001>
module attributes {stable_mosaic.version = 11 : i64} {
  func.func @cls_head_kernel(%arg0: i32, %arg1: i32, %arg2: i32, %arg3: memref<1x32x2048xf32, #tpu.memory_space<vmem>>, %arg4: memref<2048x8xf32, #tpu.memory_space<vmem>>, %arg5: memref<32x128xf32, #tpu.memory_space<vmem>>, %arg6: memref<1x1x128xf32, #tpu.memory_space<vmem>>, %arg7: memref<1x1x8x128xf32, #tpu.memory_space<vmem>>, %arg8: memref<8x128xf32, #tpu.memory_space<vmem>>) attributes {dimension_semantics = [#tpu.dimension_semantics<parallel>, #tpu.dimension_semantics<parallel>, #tpu.dimension_semantics<arbitrary>], iteration_bounds = array<i64: 4, 1, 1>, scalar_prefetch = 0 : i64, scratch_operands = 1 : i64, tpu.core_type = #tpu.core_type<tc>, window_params = [{transform_indices = @transform_0, window_bounds = array<i64: 1, 32, 2048>}, {pipeline_mode = #tpu.pipeline_mode<synchronous>, transform_indices = @transform_1, window_bounds = array<i64: 2048, 8>}, {transform_indices = @transform_2, window_bounds = array<i64: 32, 128>}, {transform_indices = @transform_3, window_bounds = array<i64: 1, 1, 128>}, {transform_indices = @transform_4, window_bounds = array<i64: 1, 1, 8, 128>}]} {
    %c0_i32 = arith.constant 0 : i32
    %0 = arith.cmpi eq, %arg2, %c0_i32 : i32
    %1 = arith.extui %0 : i1 to i32
    %c0_i32_0 = arith.constant 0 : i32
    %2 = arith.cmpi ne, %1, %c0_i32_0 : i32
    scf.if %2 {
      %cst_14 = arith.constant 0.000000e+00 : f32
      %15 = vector.broadcast %cst_14 : f32 to vector<8x128xf32>
      %c0_15 = arith.constant 0 : index
      %c0_16 = arith.constant 0 : index
      %16 = vector.load %arg8[%c0_15, %c0_16] : memref<8x128xf32, #tpu.memory_space<vmem>>, vector<8x128xf32>
      tpu.vector_store %arg8[%c0_15, %c0_16], %15 {strides = array<i32>} : memref<8x128xf32, #tpu.memory_space<vmem>>, vector<8x128xf32>,
    } else {
    }
    %c0 = arith.constant 0 : index
    %c0_1 = arith.constant 0 : index
    %c0_2 = arith.constant 0 : index
    %3 = vector.load %arg3[%c0, %c0_1, %c0_2] : memref<1x32x2048xf32, #tpu.memory_space<vmem>>, vector<1x32x2048xf32>
    %4 = vector.shape_cast %3 : vector<1x32x2048xf32> to vector<32x2048xf32>
    %c0_3 = arith.constant 0 : index
    %c0_4 = arith.constant 0 : index
    %5 = vector.load %arg4[%c0_3, %c0_4] : memref<2048x8xf32, #tpu.memory_space<vmem>>, vector<2048x8xf32>
    %cst = arith.constant dense<0.000000e+00> : vector<32x8xf32>
    %6 = tpu.matmul %4, %5, %cst {dimension_numbers = #tpu.dot_dimension_numbers<[1], [0], [0], [1], [0, 0, 1, 1], [], []>} : vector<32x2048xf32>, vector<2048x8xf32>, vector<32x8xf32> -> vector<32x8xf32>
    %c0_5 = arith.constant 0 : index
    %c0_6 = arith.constant 0 : index
    %7 = vector.load %arg8[%c0_5, %c0_6] : memref<8x128xf32, #tpu.memory_space<vmem>>, vector<8x128xf32>
    %c0_7 = arith.constant 0 : index
    %c0_8 = arith.constant 0 : index
    %8 = vector.load %arg5[%c0_7, %c0_8] : memref<32x128xf32, #tpu.memory_space<vmem>>, vector<32x128xf32>
    %cst_9 = arith.constant dense<0.000000e+00> : vector<8x128xf32>
    %9 = tpu.matmul %6, %8, %cst_9 {dimension_numbers = #tpu.dot_dimension_numbers<[0], [0], [1], [1], [0, 1, 1, 1], [], []>} : vector<32x8xf32>, vector<32x128xf32>, vector<8x128xf32> -> vector<8x128xf32>
    %10 = arith.addf %7, %9 : vector<8x128xf32>
    %c0_10 = arith.constant 0 : index
    %c0_11 = arith.constant 0 : index
    %11 = vector.load %arg8[%c0_10, %c0_11] : memref<8x128xf32, #tpu.memory_space<vmem>>, vector<8x128xf32>
    tpu.vector_store %arg8[%c0_10, %c0_11], %10 {strides = array<i32>} : memref<8x128xf32, #tpu.memory_space<vmem>>, vector<8x128xf32>,
    %c0_i32_12 = arith.constant 0 : i32
    %12 = arith.cmpi eq, %arg2, %c0_i32_12 : i32
    %13 = arith.extui %12 : i1 to i32
    %c0_i32_13 = arith.constant 0 : i32
    %14 = arith.cmpi ne, %13, %c0_i32_13 : i32
    scf.if %14 {
      %c0_14 = arith.constant 0 : index
      %c0_15 = arith.constant 0 : index
      %15 = vector.load %arg8[%c0_14, %c0_15] : memref<8x128xf32, #tpu.memory_space<vmem>>, vector<8x128xf32>
      %c0_16 = arith.constant 0 : index
      %c0_17 = arith.constant 0 : index
      %c0_18 = arith.constant 0 : index
      %16 = vector.load %arg6[%c0_16, %c0_17, %c0_18] : memref<1x1x128xf32, #tpu.memory_space<vmem>>, vector<1x1x128xf32>
      %17 = vector.shape_cast %16 : vector<1x1x128xf32> to vector<1x128xf32>
      %18 = vector.broadcast %17 : vector<1x128xf32> to vector<8x128xf32>
      %19 = arith.addf %15, %18 : vector<8x128xf32>
      %c0_19 = arith.constant 0 : index
      %c0_20 = arith.constant 0 : index
      %c0_21 = arith.constant 0 : index
      %c0_22 = arith.constant 0 : index
      %20 = vector.load %arg7[%c0_19, %c0_20, %c0_21, %c0_22] : memref<1x1x8x128xf32, #tpu.memory_space<vmem>>, vector<1x1x8x128xf32>
      %21 = vector.shape_cast %20 : vector<1x1x8x128xf32> to vector<8x128xf32>
      %22 = vector.shape_cast %19 : vector<8x128xf32> to vector<1x1x8x128xf32>
      tpu.vector_store %arg7[%c0_19, %c0_20, %c0_21, %c0_22], %22 {strides = array<i32>} : memref<1x1x8x128xf32, #tpu.memory_space<vmem>>, vector<1x1x8x128xf32>,
    } else {
    }
    return
  }
  func.func @transform_0(%arg0: i32, %arg1: i32, %arg2: i32) -> (i32, i32, i32) {
    %c1_i32 = arith.constant 1 : i32
    %0 = arith.muli %arg1, %c1_i32 : i32
    %1 = arith.addi %0, %arg2 : i32
    %c0_i32 = arith.constant 0 : i32
    %c0_i32_0 = arith.constant 0 : i32
    return %arg0, %1, %c0_i32 : i32, i32, i32
  }
  func.func @transform_1(%arg0: i32, %arg1: i32, %arg2: i32) -> (i32, i32) {
    %c0_i32 = arith.constant 0 : i32
    %c0_i32_0 = arith.constant 0 : i32
    %c0_i32_1 = arith.constant 0 : i32
    return %c0_i32, %c0_i32_0 : i32, i32
  }
  func.func @transform_2(%arg0: i32, %arg1: i32, %arg2: i32) -> (i32, i32) {
    %c1_i32 = arith.constant 1 : i32
    %0 = arith.muli %arg1, %c1_i32 : i32
    %1 = arith.addi %0, %arg2 : i32
    %c0_i32 = arith.constant 0 : i32
    %c0_i32_0 = arith.constant 0 : i32
    return %1, %c0_i32 : i32, i32
  }
  func.func @transform_3(%arg0: i32, %arg1: i32, %arg2: i32) -> (i32, i32, i32) {
    %c0_i32 = arith.constant 0 : i32
    %c0_i32_0 = arith.constant 0 : i32
    %c0_i32_1 = arith.constant 0 : i32
    return %arg1, %c0_i32, %c0_i32_0 : i32, i32, i32
  }
  func.func @transform_4(%arg0: i32, %arg1: i32, %arg2: i32) -> (i32, i32, i32, i32) {
    %c0_i32 = arith.constant 0 : i32
    %c0_i32_0 = arith.constant 0 : i32
    %c0_i32_1 = arith.constant 0 : i32
    return %arg0, %arg1, %c0_i32, %c0_i32_0 : i32, i32, i32, i32
  }
}

</mosaic_0001>

<bundles_post_ra>
// kernel: tpu_custom_call.1
= control target key start
LH: loop header
LB: loop body
LE: loop exit
PB: predicated region body
PF: predicated region fallthrough
CT: control target
= control target key end

     0   :  { %9 = vsyncpa [#allocation4], 0  ;;  %s2401_s0 = inlined_call_operand.vmem [shape: f32[4,32,2048], index: 0, kind: input, shape index: {}]   ;;  %s2402_s1 = inlined_call_operand.vmem [shape: f32[2048,8], index: 1, kind: input, shape index: {}]   ;;  %s2403_s2 = inlined_call_operand.vmem [shape: f32[32,128], index: 2, kind: input, shape index: {}]   ;;  %s2404_s3 = inlined_call_operand.vmem [shape: f32[1,1,128], index: 3, kind: input, shape index: {}]   ;;  %s2405_s4 = inlined_call_operand.hbm [shape: f32[4,1,8,128], index: 4, kind: output, shape index: {}]  }
   0x1   :  { %11 = vsyncpa [#allocation4 + $0x1], 0  ;;  %s1450_s15 = smov 0   ;;  %s1452_s16 = smov 0  }
   0x2   :  { %s1454_s17 = smov 0   ;;  %s1456_s18 = smov 0  }
   0x3   :  { %s1458_s19 = smov 0   ;;  %s1460_s20 = smov 0  }
   0x4 LB: > { %s1272_s21 = sadd.s32 4294967295, %s1423_s20   ;;  %s1273_s22 = sadd.s32 4294967294, %s1423_s20   ;;  %s1423_s20 = sphi %s1460_s20, %s17_s20   ;;  %s1419_s19 = sphi %s1458_s19, %s2412_s19   ;;  %s1415_s18 = sphi %s1456_s18, %s2411_s18   ;;  %s1411_s17 = sphi %s1454_s17, %s2410_s17   ;;  %s1407_s16 = sphi %s1452_s16, %s2409_s16   ;;  %s1403_s15 = sphi %s1450_s15, %s2408_s15  }
   0x5   : > { %s36_s23 = sadd.s32 1, %s1419_s19  ;;  %s150_s24 = sadd.s32 1, %s1411_s17 }
   0x6   : > { %p38_p0 = scmp.ge.s32.totalorder %s36_s23, 4  ;;  %p160_p1 = scmp.ne.s32.totalorder %s1411_s17, %s1407_s16 }
   0x7   : > { %p161_p2 = scmp.eq.s32.totalorder %s1272_s21, 3  ;;  %p166_p3 = scmp.ne.s32.totalorder %s1407_s16, %s1403_s15 }
   0x8   : > { %s2414_s23 = smov (%p38_p0, %s36_s23), 0  ;;  %p167_p5 = scmp.eq.s32.totalorder %s1273_s22, 3 }
   0x9   : > { %p1490_p4 = por %p161_p2, %p160_p1  ;;  %s145_s26 = ssub.s32 %s1419_s19, %s2414_s23 }
   0xa   : > { %p1278_p6 = scmp.ge.s32.totalorder %s1423_s20, 1  ;;  %p148_p7 = scmp.eq.s32.totalorder %s145_s26, 0 }
   0xb   : > { %p1497_p8 = por %p167_p5, %p166_p3  ;;  %p221_p9 = scmp.lt.s32.totalorder %s1423_s20, 5 }
   0xc   : > { %s1503_s28 = scalar_select %p148_p7, %s1411_s17, %s150_s24  }
   0xd   : > { %p222_p10 = pnand %p1278_p6, %p221_p9 }
   0xe   : > { %p264_p11 = scmp.lt.s32.totalorder (!%p222_p10), %s1415_s18, 3  ;;  %s259_s9 = sand.u32 (!%p222_p10), 1, %s1407_s16  }
   0xf   : > { %225 = sbr.rel (%p222_p10) target bundleno = 605 (0x25d), region = 36  ;;  %s1279_s10 = sshll.u32 (!%p222_p10), %s259_s9, 3 }
  0x10   : > { %s1284_s14 = sshll.u32 (!%p222_p10), %s1415_s18, 3  ;;  %s1149_s5 = scalar_lea.sflag (!%p222_p10), [#allocation4], %s259_s9 }
  0x11   : > { %s1160_s24 = scalar_lea.hbm (!%p222_p10), %s2405_s4, %s1284_s14  ;;  %s1365_s8 = scalar_lea.hbm (!%p222_p10), %s2405_s4, 32 }
  0x12   : > { %s1164_s30 = sshll.u32 (!%p222_p10), %s1160_s24, 4  ;;  %s1165_s30 = int_to_ptr.hbm [resolvable:$true] %s1164_s30 }
  0x14   : > { %v370_v0 = vld [vmem:[%s2402_s1 + $0x78] sm:$0xff]  ;;  %v369_v2 = vld [vmem:[%s2402_s1 + $0x70] sm:$0xff]  ;;  %v368_v6 = vld [vmem:[%s2402_s1 + $0x68] sm:$0xff]  ;;  %s1641_s11 = scalar_select %p264_p11, %s1415_s18, 3  ;;  %vm1112_vm0 = vcmask 261120  }
  0x15   : > { %v402_v1 = vld [vmem:[%s2402_s1 + $0x178] sm:$0xff]  ;;  %611 = vmatpush.msra.mxu0 %v370_v0  ;;  %v401_v4 = vld [vmem:[%s2402_s1 + $0x170] sm:$0xff]  ;;  %v400_v8 = vld [vmem:[%s2402_s1 + $0x168] sm:$0xff] }
  0x16   : > { %669 = vmatpush.msra.mxu2 %v402_v1  ;;  %v386_v3 = vld [vmem:[%s2402_s1 + $0xf8] sm:$0xff]  ;;  %v385_v7 = vld [vmem:[%s2402_s1 + $0xf0] sm:$0xff]  ;;  %v384_v10 = vld [vmem:[%s2402_s1 + $0xe8] sm:$0xff]  ;;  %s1287_s13 = sshll.u32 %s1641_s11, 9  ;;  %s1359_s11 = sshra.s32 %s1165_s30, 4  ;;  %s1360_s11 = int_to_ptr.hbm [resolvable:$true] %s1359_s11 }
  0x17   : > { %v418_v5 = vld [vmem:[%s2402_s1 + $0x1f8] sm:$0xff]  ;;  %640 = vmatpush.msra.mxu1 %v386_v3  ;;  %612 = vmatpush.msra.mxu0 %v369_v2  ;;  %v417_v9 = vld [vmem:[%s2402_s1 + $0x1f0] sm:$0xff]  ;;  %v367_v11 = vld [vmem:[%s2402_s1 + $0x60] sm:$0xff]  ;;  %s1689_s12 = scalar_lea.vmem %s2401_s0, %s1287_s13  ;;  %s1361_s18 = scalar_lea.hbm %s1360_s11, 8 }
  0x18   : > { %698 = vmatpush.msra.mxu3 %v418_v5  ;;  %670 = vmatpush.msra.mxu2 %v401_v4  ;;  %v399_v12 = vld [vmem:[%s2402_s1 + $0x160] sm:$0xff]  ;;  %v416_v13 = vld [vmem:[%s2402_s1 + $0x1e8] sm:$0xff]  ;;  %v366_v16 = vld [vmem:[%s2402_s1 + $0x58] sm:$0xff]  ;;  %p1362_p12 = scmp.ne.s32.totalorder %s1360_s11, %s1361_s18  ;;  %p1366_p1 = scmp.lt.s32.totalorder %s1360_s11, %s2405_s4 }
  0x19   : > { %641 = vmatpush.msra.mxu1 %v385_v7  ;;  %613 = vmatpush.msra.mxu0 %v368_v6  ;;  %v383_v14 = vld [vmem:[%s2402_s1 + $0xe0] sm:$0xff]  ;;  %v398_v17 = vld [vmem:[%s2402_s1 + $0x158] sm:$0xff]  ;;  %v365_v20 = vld [vmem:[%s2402_s1 + $0x50] sm:$0xff]  ;;  %p1367_p2 = scmp.lt.s32.totalorder %s1365_s8, %s1361_s18 }
  0x1a   : > { %699 = vmatpush.msra.mxu3 %v417_v9  ;;  %671 = vmatpush.msra.mxu2 %v400_v8  ;;  %v415_v15 = vld [vmem:[%s2402_s1 + $0x1e0] sm:$0xff]  ;;  %v382_v18 = vld [vmem:[%s2402_s1 + $0xd8] sm:$0xff]  ;;  %v397_v21 = vld [vmem:[%s2402_s1 + $0x150] sm:$0xff]  ;;  %p1363_p13 = pnand %p1362_p12, %p1490_p4 }
  0x1b   : > { %642 = vmatpush.msra.mxu1 %v384_v10  ;;  %614 = vmatpush.msra.mxu0 %v367_v11  ;;  %v414_v19 = vld [vmem:[%s2402_s1 + $0x1d8] sm:$0xff]  ;;  %v381_v22 = vld [vmem:[%s2402_s1 + $0xd0] sm:$0xff]  ;;  %v364_v24 = vld [vmem:[%s2402_s1 + $0x48] sm:$0xff]  ;;  %p1368_p3 = por %p1367_p2, %p1366_p1 }
  0x1c   : > { %700 = vmatpush.msra.mxu3 %v416_v13  ;;  %672 = vmatpush.msra.mxu2 %v399_v12  ;;  %v413_v23 = vld [vmem:[%s2402_s1 + $0x1d0] sm:$0xff]  ;;  %v396_v25 = vld [vmem:[%s2402_s1 + $0x148] sm:$0xff]  ;;  %v363_v28 = vld [vmem:[%s2402_s1 + $0x40] sm:$0xff]  ;;  %p1364_p0 = pneg %p1363_p13 }
  0x1d   : > { %643 = vmatpush.msra.mxu1 %v383_v14  ;;  %615 = vmatpush.msra.mxu0 %v366_v16  ;;  %v380_v26 = vld [vmem:[%s2402_s1 + $0xc8] sm:$0xff]  ;;  %v395_v29 = vld [vmem:[%s2402_s1 + $0x140] sm:$0xff]  ;;  %v362_v32 = vld [vmem:[%s2402_s1 + $0x38] sm:$0xff] }
  0x1e   : > { %701 = vmatpush.msra.mxu3 %v415_v15  ;;  %673 = vmatpush.msra.mxu2 %v398_v17  ;;  %v412_v27 = vld [vmem:[%s2402_s1 + $0x1c8] sm:$0xff]  ;;  %v379_v30 = vld [vmem:[%s2402_s1 + $0xc0] sm:$0xff]  ;;  %v394_v33 = vld [vmem:[%s2402_s1 + $0x138] sm:$0xff]  ;;  %p1369_p5 = pnand %p1368_p3, %p1364_p0 }
  0x1f   : > { %644 = vmatpush.msra.mxu1 %v382_v18  ;;  %616 = vmatpush.msra.mxu0 %v365_v20  ;;  %v411_v31 = vld [vmem:[%s2402_s1 + $0x1c0] sm:$0xff]  ;;  %v378_v34 = vld [vmem:[%s2402_s1 + $0xb8] sm:$0xff]  ;;  %v361_v36 = vld [vmem:[%s2402_s1 + $0x30] sm:$0xff] }
  0x20   : > { %702 = vmatpush.msra.mxu3 %v414_v19  ;;  %674 = vmatpush.msra.mxu2 %v397_v21  ;;  %v410_v35 = vld [vmem:[%s2402_s1 + $0x1b8] sm:$0xff]  ;;  %v393_v37 = vld [vmem:[%s2402_s1 + $0x130] sm:$0xff]  ;;  %v360_v40 = vld [vmem:[%s2402_s1 + $0x28] sm:$0xff] }
  0x21   : > { %645 = vmatpush.msra.mxu1 %v381_v22  ;;  %617 = vmatpush.msra.mxu0 %v364_v24  ;;  %v377_v38 = vld [vmem:[%s2402_s1 + $0xb0] sm:$0xff]  ;;  %v392_v41 = vld [vmem:[%s2402_s1 + $0x128] sm:$0xff]  ;;  %v359_v44 = vld [vmem:[%s2402_s1 + $0x20] sm:$0xff] }
  0x22   : > { %703 = vmatpush.msra.mxu3 %v413_v23  ;;  %675 = vmatpush.msra.mxu2 %v396_v25  ;;  %v409_v39 = vld [vmem:[%s2402_s1 + $0x1b0] sm:$0xff]  ;;  %v376_v42 = vld [vmem:[%s2402_s1 + $0xa8] sm:$0xff]  ;;  %v391_v45 = vld [vmem:[%s2402_s1 + $0x120] sm:$0xff] }
  0x23   : > { %646 = vmatpush.msra.mxu1 %v380_v26  ;;  %618 = vmatpush.msra.mxu0 %v363_v28  ;;  %v408_v43 = vld [vmem:[%s2402_s1 + $0x1a8] sm:$0xff]  ;;  %v375_v46 = vld [vmem:[%s2402_s1 + $0xa0] sm:$0xff]  ;;  %v358_v48 = vld [vmem:[%s2402_s1 + $0x18] sm:$0xff] }
  0x24   : > { %704 = vmatpush.msra.mxu3 %v412_v27  ;;  %676 = vmatpush.msra.mxu2 %v395_v29  ;;  %v407_v47 = vld [vmem:[%s2402_s1 + $0x1a0] sm:$0xff]  ;;  %v390_v49 = vld [vmem:[%s2402_s1 + $0x118] sm:$0xff]  ;;  %v357_v52 = vld [vmem:[%s2402_s1 + $0x10] sm:$0xff] }
  0x25   : > { %647 = vmatpush.msra.mxu1 %v379_v30  ;;  %619 = vmatpush.msra.mxu0 %v362_v32  ;;  %v374_v50 = vld [vmem:[%s2402_s1 + $0x98] sm:$0xff]  ;;  %v389_v53 = vld [vmem:[%s2402_s1 + $0x110] sm:$0xff]  ;;  %v356_v56 = vld [vmem:[%s2402_s1 + $0x8] sm:$0xff] }
  0x26   : > { %705 = vmatpush.msra.mxu3 %v411_v31  ;;  %677 = vmatpush.msra.mxu2 %v394_v33  ;;  %v406_v51 = vld [vmem:[%s2402_s1 + $0x198] sm:$0xff]  ;;  %v373_v54 = vld [vmem:[%s2402_s1 + $0x90] sm:$0xff]  ;;  %v388_v57 = vld [vmem:[%s2402_s1 + $0x108] sm:$0xff] }
  0x27   : > { %648 = vmatpush.msra.mxu1 %v378_v34  ;;  %620 = vmatpush.msra.mxu0 %v361_v36  ;;  %v405_v55 = vld [vmem:[%s2402_s1 + $0x190] sm:$0xff]  ;;  %v372_v58 = vld [vmem:[%s2402_s1 + $0x88] sm:$0xff]  ;;  %v355_v60 = vld [vmem:[%s2402_s1] sm:$0xff] }
  0x28   : > { %706 = vmatpush.msra.mxu3 %v410_v35  ;;  %678 = vmatpush.msra.mxu2 %v393_v37  ;;  %v404_v59 = vld [vmem:[%s2402_s1 + $0x188] sm:$0xff]  ;;  %v387_v61 = vld [vmem:[%s2402_s1 + $0x100] sm:$0xff]  ;;  %v293_v63 = vld [vmem:[%s1689_s12 + $0x10] sm:$0xff] }
  0x29   : > { %649 = vmatpush.msra.mxu1 %v377_v38  ;;  %621 = vmatpush.msra.mxu0 %v360_v40  ;;  %v291_v62 = vld [vmem:[%s1689_s12] sm:$0xff]  ;;  %v466_v0 = vld [vmem:[%s2402_s1 + $0x378] sm:$0xff]  ;;  %v292_v4 = vld [vmem:[%s1689_s12 + $0x8] sm:$0xff] }
  0x2a   : > { %707 = vmatpush.msra.mxu3 %v409_v39  ;;  %679 = vmatpush.msra.mxu2 %v392_v41  ;;  %v371_v1 = vld [vmem:[%s2402_s1 + $0x80] sm:$0xff]  ;;  %v434_v3 = vld [vmem:[%s2402_s1 + $0x278] sm:$0xff]  ;;  %v465_v6 = vld [vmem:[%s2402_s1 + $0x370] sm:$0xff] }
  0x2b   : > { %650 = vmatpush.msra.mxu1 %v376_v42  ;;  %622 = vmatpush.msra.mxu0 %v359_v44  ;;  %v403_v2 = vld [vmem:[%s2402_s1 + $0x180] sm:$0xff]  ;;  %v294_v5 = vld [vmem:[%s1689_s12 + $0x18] sm:$0xff]  ;;  %v433_v8 = vld [vmem:[%s2402_s1 + $0x270] sm:$0xff] }
  0x2c   : > { %708 = vmatpush.msra.mxu3 %v408_v43  ;;  %680 = vmatpush.msra.mxu2 %v391_v45  ;;  %v482_v7 = vld [vmem:[%s2402_s1 + $0x3f8] sm:$0xff]  ;;  %v464_v10 = vld [vmem:[%s2402_s1 + $0x368] sm:$0xff]  ;;  %v481_v11 = vld [vmem:[%s2402_s1 + $0x3f0] sm:$0xff] }
  0x2d   : > { %651 = vmatpush.msra.mxu1 %v375_v46  ;;  %623 = vmatpush.msra.mxu0 %v358_v48  ;;  %v450_v9 = vld [vmem:[%s2402_s1 + $0x2f8] sm:$0xff]  ;;  %v432_v12 = vld [vmem:[%s2402_s1 + $0x268] sm:$0xff]  ;;  %v449_v13 = vld [vmem:[%s2402_s1 + $0x2f0] sm:$0xff] }
  0x2e   : > { %709 = vmatpush.msra.mxu3 %v407_v47  ;;  %681 = vmatpush.msra.mxu2 %v390_v49  ;;  %v463_v14 = vld [vmem:[%s2402_s1 + $0x360] sm:$0xff]  ;;  %v480_v15 = vld [vmem:[%s2402_s1 + $0x3e8] sm:$0xff]  ;;  %v309_v19 = vld [vmem:[%s1689_s12 + $0x90] sm:$0xff] }
  0x2f   : > { %652 = vmatpush.msra.mxu1 %v374_v50  ;;  %624 = vmatpush.msra.mxu0 %v357_v52  ;;  %v431_v16 = vld [vmem:[%s2402_s1 + $0x260] sm:$0xff]  ;;  %v448_v17 = vld [vmem:[%s2402_s1 + $0x2e8] sm:$0xff]  ;;  %v462_v20 = vld [vmem:[%s2402_s1 + $0x358] sm:$0xff] }
  0x30   : > { %710 = vmatpush.msra.mxu3 %v406_v51  ;;  %682 = vmatpush.msra.mxu2 %v389_v53  ;;  %v307_v18 = vld [vmem:[%s1689_s12 + $0x80] sm:$0xff]  ;;  %v430_v22 = vld [vmem:[%s2402_s1 + $0x258] sm:$0xff]  ;;  %v308_v24 = vld [vmem:[%s1689_s12 + $0x88] sm:$0xff] }
  0x31   : > { %653 = vmatpush.msra.mxu1 %v373_v54  ;;  %625 = vmatpush.msra.mxu0 %v356_v56  ;;  %v479_v21 = vld [vmem:[%s2402_s1 + $0x3e0] sm:$0xff]  ;;  %v310_v25 = vld [vmem:[%s1689_s12 + $0x98] sm:$0xff]  ;;  %v461_v26 = vld [vmem:[%s2402_s1 + $0x350] sm:$0xff] }
  0x32   : > { %711 = vmatpush.msra.mxu3 %v405_v55  ;;  %683 = vmatpush.msra.mxu2 %v388_v57  ;;  %v447_v23 = vld [vmem:[%s2402_s1 + $0x2e0] sm:$0xff]  ;;  %v478_v27 = vld [vmem:[%s2402_s1 + $0x3d8] sm:$0xff]  ;;  %v429_v28 = vld [vmem:[%s2402_s1 + $0x250] sm:$0xff] }
  0x33   : > { %654 = vmatpush.msra.mxu1 %v372_v58  ;;  %626 = vmatpush.msra.mxu0 %v355_v60  ;;  %v446_v29 = vld [vmem:[%s2402_s1 + $0x2d8] sm:$0xff]  ;;  %v460_v30 = vld [vmem:[%s2402_s1 + $0x348] sm:$0xff]  ;;  %v477_v31 = vld [vmem:[%s2402_s1 + $0x3d0] sm:$0xff] }
  0x34   : > { %712 = vmatpush.msra.mxu3 %v404_v59  ;;  %684 = vmatpush.msra.mxu2 %v387_v61  ;;  %v428_v32 = vld [vmem:[%s2402_s1 + $0x248] sm:$0xff]  ;;  %v445_v33 = vld [vmem:[%s2402_s1 + $0x2d0] sm:$0xff]  ;;  %v459_v34 = vld [vmem:[%s2402_s1 + $0x340] sm:$0xff] }
  0x35   : > { %627 = vmatmul.f32.vlgmr.msra.gmra.mxu0 %v291_v62  ;;  %685 = vmatmul.f32.vlgmr.msra.gmra.mxu2 %v293_v63  ;;  %v476_v35 = vld [vmem:[%s2402_s1 + $0x3c8] sm:$0xff]  ;;  %v427_v36 = vld [vmem:[%s2402_s1 + $0x240] sm:$0xff]  ;;  %v325_v39 = vld [vmem:[%s1689_s12 + $0x110] sm:$0xff] }
  0x36   : > { %785 = vmatpush.msrb.mxu2 %v466_v0  ;;  %655 = vmatpush.msra.mxu1 %v371_v1  ;;  %v444_v37 = vld [vmem:[%s2402_s1 + $0x2c8] sm:$0xff]  ;;  %v323_v38 = vld [vmem:[%s1689_s12 + $0x100] sm:$0xff]  ;;  %v458_v40 = vld [vmem:[%s2402_s1 + $0x338] sm:$0xff] }
  0x37   : > { %713 = vmatpush.msra.mxu3 %v403_v2  ;;  %727 = vmatpush.msrb.mxu0 %v434_v3  ;;  %v475_v41 = vld [vmem:[%s2402_s1 + $0x3c0] sm:$0xff]  ;;  %v426_v42 = vld [vmem:[%s2402_s1 + $0x238] sm:$0xff]  ;;  %v324_v44 = vld [vmem:[%s1689_s12 + $0x108] sm:$0xff] }
  0x38   : > { %656 = vmatmul.f32.vlgmr.msra.gmra.mxu1 %v292_v4  ;;  %714 = vmatmul.f32.vlgmr.msra.gmra.mxu3 %v294_v5  ;;  %v443_v43 = vld [vmem:[%s2402_s1 + $0x2c0] sm:$0xff]  ;;  %v326_v45 = vld [vmem:[%s1689_s12 + $0x118] sm:$0xff]  ;;  %v457_v46 = vld [vmem:[%s2402_s1 + $0x330] sm:$0xff] }
  0x39   : > { %786 = vmatpush.msrb.mxu2 %v465_v6  ;;  %814 = vmatpush.msrb.mxu3 %v482_v7  ;;  %v474_v47 = vld [vmem:[%s2402_s1 + $0x3b8] sm:$0xff]  ;;  %v425_v48 = vld [vmem:[%s2402_s1 + $0x230] sm:$0xff]  ;;  %v456_v50 = vld [vmem:[%s2402_s1 + $0x328] sm:$0xff] }
  0x3a   : > { %728 = vmatpush.msrb.mxu0 %v433_v8  ;;  %756 = vmatpush.msrb.mxu1 %v450_v9  ;;  %v442_v49 = vld [vmem:[%s2402_s1 + $0x2b8] sm:$0xff]  ;;  %v473_v51 = vld [vmem:[%s2402_s1 + $0x3b0] sm:$0xff]  ;;  %v424_v52 = vld [vmem:[%s2402_s1 + $0x228] sm:$0xff] }
  0x3b   : > { %787 = vmatpush.msrb.mxu2 %v464_v10  ;;  %815 = vmatpush.msrb.mxu3 %v481_v11  ;;  %v441_v53 = vld [vmem:[%s2402_s1 + $0x2b0] sm:$0xff]  ;;  %v455_v54 = vld [vmem:[%s2402_s1 + $0x320] sm:$0xff]  ;;  %v472_v55 = vld [vmem:[%s2402_s1 + $0x3a8] sm:$0xff] }
  0x3c   : > { %729 = vmatpush.msrb.mxu0 %v432_v12  ;;  %757 = vmatpush.msrb.mxu1 %v449_v13  ;;  %v423_v56 = vld [vmem:[%s2402_s1 + $0x220] sm:$0xff]  ;;  %v440_v57 = vld [vmem:[%s2402_s1 + $0x2a8] sm:$0xff]  ;;  %v341_v59 = vld [vmem:[%s1689_s12 + $0x190] sm:$0xff] }
  0x3d   : > { %788 = vmatpush.msrb.mxu2 %v463_v14  ;;  %816 = vmatpush.msrb.mxu3 %v480_v15  ;;  %v339_v58 = vld [vmem:[%s1689_s12 + $0x180] sm:$0xff]  ;;  %v454_v60 = vld [vmem:[%s2402_s1 + $0x318] sm:$0xff]  ;;  %v340_v0 = vld [vmem:[%s1689_s12 + $0x188] sm:$0xff] }
  0x3e   : > { %730 = vmatpush.msrb.mxu0 %v431_v16  ;;  %758 = vmatpush.msrb.mxu1 %v448_v17  ;;  %v471_v61 = vld [vmem:[%s2402_s1 + $0x3a0] sm:$0xff]  ;;  %v422_v62 = vld [vmem:[%s2402_s1 + $0x218] sm:$0xff]  ;;  %v453_v2 = vld [vmem:[%s2402_s1 + $0x310] sm:$0xff] }
  0x3f   : > { %630 = vmatmul.f32.gmra.mxu0 %v307_v18  ;;  %688 = vmatmul.f32.gmra.mxu2 %v309_v19  ;;  %v439_v63 = vld [vmem:[%s2402_s1 + $0x2a0] sm:$0xff]  ;;  %v342_v1 = vld [vmem:[%s1689_s12 + $0x198] sm:$0xff]  ;;  %v421_v4 = vld [vmem:[%s2402_s1 + $0x210] sm:$0xff] }
  0x40   : > { %789 = vmatpush.msrb.mxu2 %v462_v20  ;;  %817 = vmatpush.msrb.mxu3 %v479_v21  ;;  %v470_v3 = vld [vmem:[%s2402_s1 + $0x398] sm:$0xff]  ;;  %v452_v6 = vld [vmem:[%s2402_s1 + $0x308] sm:$0xff]  ;;  %v469_v7 = vld [vmem:[%s2402_s1 + $0x390] sm:$0xff] }
  0x41   : > { %731 = vmatpush.msrb.mxu0 %v430_v22  ;;  %759 = vmatpush.msrb.mxu1 %v447_v23  ;;  %v438_v5 = vld [vmem:[%s2402_s1 + $0x298] sm:$0xff]  ;;  %v420_v8 = vld [vmem:[%s2402_s1 + $0x208] sm:$0xff]  ;;  %v437_v9 = vld [vmem:[%s2402_s1 + $0x290] sm:$0xff] }
  0x42   : > { %659 = vmatmul.f32.gmra.mxu1 %v308_v24  ;;  %717 = vmatmul.f32.gmra.mxu3 %v310_v25  ;;  %v451_v10 = vld [vmem:[%s2402_s1 + $0x300] sm:$0xff]  ;;  %v468_v11 = vld [vmem:[%s2402_s1 + $0x388] sm:$0xff]  ;;  %v297_v15 = vld [vmem:[%s1689_s12 + $0x30] sm:$0xff] }
  0x43   : > { %790 = vmatpush.msrb.mxu2 %v461_v26  ;;  %818 = vmatpush.msrb.mxu3 %v478_v27  ;;  %v419_v12 = vld [vmem:[%s2402_s1 + $0x200] sm:$0xff]  ;;  %v436_v13 = vld [vmem:[%s2402_s1 + $0x288] sm:$0xff]  ;;  %v530_v17 = vld [vmem:[%s2402_s1 + $0x578] sm:$0xff] }
  0x44   : > { %732 = vmatpush.msrb.mxu0 %v429_v28  ;;  %760 = vmatpush.msrb.mxu1 %v446_v29  ;;  %v295_v14 = vld [vmem:[%s1689_s12 + $0x20] sm:$0xff]  ;;  %v498_v19 = vld [vmem:[%s2402_s1 + $0x478] sm:$0xff]  ;;  %v296_v20 = vld [vmem:[%s1689_s12 + $0x28] sm:$0xff] }
  0x45   : > { %791 = vmatpush.msrb.mxu2 %v460_v30  ;;  %819 = vmatpush.msrb.mxu3 %v477_v31  ;;  %v467_v16 = vld [vmem:[%s2402_s1 + $0x380] sm:$0xff]  ;;  %v298_v21 = vld [vmem:[%s1689_s12 + $0x38] sm:$0xff]  ;;  %v529_v22 = vld [vmem:[%s2402_s1 + $0x570] sm:$0xff] }
  0x46   : > { %733 = vmatpush.msrb.mxu0 %v428_v32  ;;  %761 = vmatpush.msrb.mxu1 %v445_v33  ;;  %v435_v18 = vld [vmem:[%s2402_s1 + $0x280] sm:$0xff]  ;;  %v546_v23 = vld [vmem:[%s2402_s1 + $0x5f8] sm:$0xff]  ;;  %v497_v24 = vld [vmem:[%s2402_s1 + $0x470] sm:$0xff] }
  0x47   : > { %792 = vmatpush.msrb.mxu2 %v459_v34  ;;  %820 = vmatpush.msrb.mxu3 %v476_v35  ;;  %v514_v25 = vld [vmem:[%s2402_s1 + $0x4f8] sm:$0xff]  ;;  %v528_v26 = vld [vmem:[%s2402_s1 + $0x568] sm:$0xff]  ;;  %v545_v27 = vld [vmem:[%s2402_s1 + $0x5f0] sm:$0xff] }
  0x48   : > { %734 = vmatpush.msrb.mxu0 %v427_v36  ;;  %762 = vmatpush.msrb.mxu1 %v444_v37  ;;  %v496_v28 = vld [vmem:[%s2402_s1 + $0x468] sm:$0xff]  ;;  %v513_v29 = vld [vmem:[%s2402_s1 + $0x4f0] sm:$0xff]  ;;  %v527_v30 = vld [vmem:[%s2402_s1 + $0x560] sm:$0xff] }
  0x49   : > { %633 = vmatmul.f32.gmra.mxu0 %v323_v38  ;;  %691 = vmatmul.f32.gmra.mxu2 %v325_v39  ;;  %v544_v31 = vld [vmem:[%s2402_s1 + $0x5e8] sm:$0xff]  ;;  %v495_v32 = vld [vmem:[%s2402_s1 + $0x460] sm:$0xff]  ;;  %v313_v35 = vld [vmem:[%s1689_s12 + $0xb0] sm:$0xff] }
  0x4a   : > { %793 = vmatpush.msrb.mxu2 %v458_v40  ;;  %821 = vmatpush.msrb.mxu3 %v475_v41  ;;  %v512_v33 = vld [vmem:[%s2402_s1 + $0x4e8] sm:$0xff]  ;;  %v311_v34 = vld [vmem:[%s1689_s12 + $0xa0] sm:$0xff]  ;;  %v526_v36 = vld [vmem:[%s2402_s1 + $0x558] sm:$0xff] }
  0x4b   : > { %735 = vmatpush.msrb.mxu0 %v426_v42  ;;  %763 = vmatpush.msrb.mxu1 %v443_v43  ;;  %v543_v37 = vld [vmem:[%s2402_s1 + $0x5e0] sm:$0xff]  ;;  %v494_v38 = vld [vmem:[%s2402_s1 + $0x458] sm:$0xff]  ;;  %v312_v40 = vld [vmem:[%s1689_s12 + $0xa8] sm:$0xff] }
  0x4c   : > { %662 = vmatmul.f32.gmra.mxu1 %v324_v44  ;;  %720 = vmatmul.f32.gmra.mxu3 %v326_v45  ;;  %v511_v39 = vld [vmem:[%s2402_s1 + $0x4e0] sm:$0xff]  ;;  %v314_v41 = vld [vmem:[%s1689_s12 + $0xb8] sm:$0xff]  ;;  %v525_v42 = vld [vmem:[%s2402_s1 + $0x550] sm:$0xff] }
  0x4d   : > { %794 = vmatpush.msrb.mxu2 %v457_v46  ;;  %822 = vmatpush.msrb.mxu3 %v474_v47  ;;  %v542_v43 = vld [vmem:[%s2402_s1 + $0x5d8] sm:$0xff]  ;;  %v493_v44 = vld [vmem:[%s2402_s1 + $0x450] sm:$0xff]  ;;  %v524_v46 = vld [vmem:[%s2402_s1 + $0x548] sm:$0xff] }
  0x4e   : > { %736 = vmatpush.msrb.mxu0 %v425_v48  ;;  %764 = vmatpush.msrb.mxu1 %v442_v49  ;;  %v510_v45 = vld [vmem:[%s2402_s1 + $0x4d8] sm:$0xff]  ;;  %v541_v47 = vld [vmem:[%s2402_s1 + $0x5d0] sm:$0xff]  ;;  %v492_v48 = vld [vmem:[%s2402_s1 + $0x448] sm:$0xff] }
  0x4f   : > { %795 = vmatpush.msrb.mxu2 %v456_v50  ;;  %823 = vmatpush.msrb.mxu3 %v473_v51  ;;  %v509_v49 = vld [vmem:[%s2402_s1 + $0x4d0] sm:$0xff]  ;;  %v523_v50 = vld [vmem:[%s2402_s1 + $0x540] sm:$0xff]  ;;  %v540_v51 = vld [vmem:[%s2402_s1 + $0x5c8] sm:$0xff] }
  0x50   : > { %737 = vmatpush.msrb.mxu0 %v424_v52  ;;  %765 = vmatpush.msrb.mxu1 %v441_v53  ;;  %v491_v52 = vld [vmem:[%s2402_s1 + $0x440] sm:$0xff]  ;;  %v508_v53 = vld [vmem:[%s2402_s1 + $0x4c8] sm:$0xff] }
  0x51   : > { %796 = vmatpush.msrb.mxu2 %v455_v54  ;;  %824 = vmatpush.msrb.mxu3 %v472_v55  ;;  %v327_v54 = vld [vmem:[%s1689_s12 + $0x120] sm:$0xff]  ;;  %v329_v55 = vld [vmem:[%s1689_s12 + $0x130] sm:$0xff] }
  0x52   : > { %738 = vmatpush.msrb.mxu0 %v423_v56  ;;  %766 = vmatpush.msrb.mxu1 %v440_v57  ;;  %v522_v56 = vld [vmem:[%s2402_s1 + $0x538] sm:$0xff]  ;;  %v539_v57 = vld [vmem:[%s2402_s1 + $0x5c0] sm:$0xff] }
  0x53   : > { %636 = vmatmul.f32.gmra.mxu0 %v339_v58  ;;  %694 = vmatmul.f32.gmra.mxu2 %v341_v59  ;;  %v490_v58 = vld [vmem:[%s2402_s1 + $0x438] sm:$0xff]  ;;  %v507_v59 = vld [vmem:[%s2402_s1 + $0x4c0] sm:$0xff] }
  0x54   : > { %797 = vmatpush.msrb.mxu2 %v454_v60  ;;  %825 = vmatpush.msrb.mxu3 %v471_v61  ;;  %v328_v60 = vld [vmem:[%s1689_s12 + $0x128] sm:$0xff]  ;;  %v330_v61 = vld [vmem:[%s1689_s12 + $0x138] sm:$0xff] }
  0x55   : > { %739 = vmatpush.msrb.mxu0 %v422_v62  ;;  %767 = vmatpush.msrb.mxu1 %v439_v63  ;;  %v521_v62 = vld [vmem:[%s2402_s1 + $0x530] sm:$0xff]  ;;  %v538_v63 = vld [vmem:[%s2402_s1 + $0x5b8] sm:$0xff] }
  0x56   : > { %665 = vmatmul.f32.gmra.mxu1 %v340_v0  ;;  %723 = vmatmul.f32.gmra.mxu3 %v342_v1  ;;  %v489_v0 = vld [vmem:[%s2402_s1 + $0x430] sm:$0xff]  ;;  %v506_v1 = vld [vmem:[%s2402_s1 + $0x4b8] sm:$0xff] }
  0x57   : > { %798 = vmatpush.msrb.mxu2 %v453_v2  ;;  %826 = vmatpush.msrb.mxu3 %v470_v3  ;;  %v520_v2 = vld [vmem:[%s2402_s1 + $0x528] sm:$0xff]  ;;  %v537_v3 = vld [vmem:[%s2402_s1 + $0x5b0] sm:$0xff] }
  0x58   : > { %740 = vmatpush.msrb.mxu0 %v421_v4  ;;  %768 = vmatpush.msrb.mxu1 %v438_v5  ;;  %v488_v4 = vld [vmem:[%s2402_s1 + $0x428] sm:$0xff]  ;;  %v505_v5 = vld [vmem:[%s2402_s1 + $0x4b0] sm:$0xff] }
  0x59   : > { %799 = vmatpush.msrb.mxu2 %v452_v6  ;;  %827 = vmatpush.msrb.mxu3 %v469_v7  ;;  %v519_v6 = vld [vmem:[%s2402_s1 + $0x520] sm:$0xff]  ;;  %v536_v7 = vld [vmem:[%s2402_s1 + $0x5a8] sm:$0xff] }
  0x5a   : > { %741 = vmatpush.msrb.mxu0 %v420_v8  ;;  %769 = vmatpush.msrb.mxu1 %v437_v9  ;;  %v487_v8 = vld [vmem:[%s2402_s1 + $0x420] sm:$0xff]  ;;  %v504_v9 = vld [vmem:[%s2402_s1 + $0x4a8] sm:$0xff] }
  0x5b   : > { %800 = vmatpush.msrb.mxu2 %v451_v10  ;;  %828 = vmatpush.msrb.mxu3 %v468_v11  ;;  %v343_v10 = vld [vmem:[%s1689_s12 + $0x1a0] sm:$0xff]  ;;  %v345_v11 = vld [vmem:[%s1689_s12 + $0x1b0] sm:$0xff] }
  0x5c   : > { %742 = vmatpush.msrb.mxu0 %v419_v12  ;;  %770 = vmatpush.msrb.mxu1 %v436_v13  ;;  %v518_v12 = vld [vmem:[%s2402_s1 + $0x518] sm:$0xff]  ;;  %v535_v13 = vld [vmem:[%s2402_s1 + $0x5a0] sm:$0xff] }
  0x5d   : > { %743 = vmatmul.f32.vlgmr.msrb.gmra.mxu0 %v295_v14  ;;  %801 = vmatmul.f32.vlgmr.msrb.gmra.mxu2 %v297_v15  ;;  %v486_v14 = vld [vmem:[%s2402_s1 + $0x418] sm:$0xff]  ;;  %v503_v15 = vld [vmem:[%s2402_s1 + $0x4a0] sm:$0xff] }
  0x5e   : > { %829 = vmatpush.msrb.mxu3 %v467_v16  ;;  %901 = vmatpush.msra.mxu2 %v530_v17  ;;  %v344_v16 = vld [vmem:[%s1689_s12 + $0x1a8] sm:$0xff]  ;;  %v346_v17 = vld [vmem:[%s1689_s12 + $0x1b8] sm:$0xff] }
  0x5f   : > { %771 = vmatpush.msrb.mxu1 %v435_v18  ;;  %843 = vmatpush.msra.mxu0 %v498_v19  ;;  %v517_v18 = vld [vmem:[%s2402_s1 + $0x510] sm:$0xff]  ;;  %v534_v19 = vld [vmem:[%s2402_s1 + $0x598] sm:$0xff] }
  0x60   : > { %772 = vmatmul.f32.vlgmr.msrb.gmra.mxu1 %v296_v20  ;;  %830 = vmatmul.f32.vlgmr.msrb.gmra.mxu3 %v298_v21  ;;  %v485_v20 = vld [vmem:[%s2402_s1 + $0x410] sm:$0xff]  ;;  %v502_v21 = vld [vmem:[%s2402_s1 + $0x498] sm:$0xff] }
  0x61   : > { %902 = vmatpush.msra.mxu2 %v529_v22  ;;  %930 = vmatpush.msra.mxu3 %v546_v23  ;;  %v516_v22 = vld [vmem:[%s2402_s1 + $0x508] sm:$0xff]  ;;  %v533_v23 = vld [vmem:[%s2402_s1 + $0x590] sm:$0xff] }
  0x62   : > { %844 = vmatpush.msra.mxu0 %v497_v24  ;;  %872 = vmatpush.msra.mxu1 %v514_v25  ;;  %v484_v24 = vld [vmem:[%s2402_s1 + $0x408] sm:$0xff]  ;;  %v501_v25 = vld [vmem:[%s2402_s1 + $0x490] sm:$0xff] }
  0x63   : > { %903 = vmatpush.msra.mxu2 %v528_v26  ;;  %931 = vmatpush.msra.mxu3 %v545_v27  ;;  %v515_v26 = vld [vmem:[%s2402_s1 + $0x500] sm:$0xff]  ;;  %v532_v27 = vld [vmem:[%s2402_s1 + $0x588] sm:$0xff] }
  0x64   : > { %845 = vmatpush.msra.mxu0 %v496_v28  ;;  %873 = vmatpush.msra.mxu1 %v513_v29  ;;  %v483_v28 = vld [vmem:[%s2402_s1 + $0x400] sm:$0xff]  ;;  %v500_v29 = vld [vmem:[%s2402_s1 + $0x488] sm:$0xff] }
  0x65   : > { %904 = vmatpush.msra.mxu2 %v527_v30  ;;  %932 = vmatpush.msra.mxu3 %v544_v31  ;;  %v299_v30 = vld [vmem:[%s1689_s12 + $0x40] sm:$0xff]  ;;  %v301_v31 = vld [vmem:[%s1689_s12 + $0x50] sm:$0xff] }
  0x66   : > { %846 = vmatpush.msra.mxu0 %v495_v32  ;;  %874 = vmatpush.msra.mxu1 %v512_v33  ;;  %v531_v32 = vld [vmem:[%s2402_s1 + $0x580] sm:$0xff]  ;;  %v594_v33 = vld [vmem:[%s2402_s1 + $0x778] sm:$0xff] }
  0x67   : > { %746 = vmatmul.f32.gmra.mxu0 %v311_v34  ;;  %804 = vmatmul.f32.gmra.mxu2 %v313_v35  ;;  %v499_v34 = vld [vmem:[%s2402_s1 + $0x480] sm:$0xff]  ;;  %v562_v35 = vld [vmem:[%s2402_s1 + $0x678] sm:$0xff] }
  0x68   : > { %905 = vmatpush.msra.mxu2 %v526_v36  ;;  %933 = vmatpush.msra.mxu3 %v543_v37  ;;  %v300_v36 = vld [vmem:[%s1689_s12 + $0x48] sm:$0xff]  ;;  %v302_v37 = vld [vmem:[%s1689_s12 + $0x58] sm:$0xff] }
  0x69   : > { %847 = vmatpush.msra.mxu0 %v494_v38  ;;  %875 = vmatpush.msra.mxu1 %v511_v39  ;;  %v593_v38 = vld [vmem:[%s2402_s1 + $0x770] sm:$0xff]  ;;  %v610_v39 = vld [vmem:[%s2402_s1 + $0x7f8] sm:$0xff] }
  0x6a   : > { %775 = vmatmul.f32.gmra.mxu1 %v312_v40  ;;  %833 = vmatmul.f32.gmra.mxu3 %v314_v41  ;;  %v561_v40 = vld [vmem:[%s2402_s1 + $0x670] sm:$0xff]  ;;  %v578_v41 = vld [vmem:[%s2402_s1 + $0x6f8] sm:$0xff] }
  0x6b   : > { %906 = vmatpush.msra.mxu2 %v525_v42  ;;  %934 = vmatpush.msra.mxu3 %v542_v43  ;;  %v592_v42 = vld [vmem:[%s2402_s1 + $0x768] sm:$0xff]  ;;  %v609_v43 = vld [vmem:[%s2402_s1 + $0x7f0] sm:$0xff] }
  0x6c   : > { %848 = vmatpush.msra.mxu0 %v493_v44  ;;  %876 = vmatpush.msra.mxu1 %v510_v45  ;;  %v560_v44 = vld [vmem:[%s2402_s1 + $0x668] sm:$0xff]  ;;  %v577_v45 = vld [vmem:[%s2402_s1 + $0x6f0] sm:$0xff] }
  0x6d   : > { %907 = vmatpush.msra.mxu2 %v524_v46  ;;  %935 = vmatpush.msra.mxu3 %v541_v47  ;;  %v591_v46 = vld [vmem:[%s2402_s1 + $0x760] sm:$0xff]  ;;  %v608_v47 = vld [vmem:[%s2402_s1 + $0x7e8] sm:$0xff] }
  0x6e   : > { %849 = vmatpush.msra.mxu0 %v492_v48  ;;  %877 = vmatpush.msra.mxu1 %v509_v49  ;;  %v559_v48 = vld [vmem:[%s2402_s1 + $0x660] sm:$0xff]  ;;  %v576_v49 = vld [vmem:[%s2402_s1 + $0x6e8] sm:$0xff] }
  0x6f   : > { %908 = vmatpush.msra.mxu2 %v523_v50  ;;  %936 = vmatpush.msra.mxu3 %v540_v51  ;;  %v315_v50 = vld [vmem:[%s1689_s12 + $0xc0] sm:$0xff]  ;;  %v317_v51 = vld [vmem:[%s1689_s12 + $0xd0] sm:$0xff] }
  0x70   : > { %850 = vmatpush.msra.mxu0 %v491_v52  ;;  %878 = vmatpush.msra.mxu1 %v508_v53  ;;  %v590_v52 = vld [vmem:[%s2402_s1 + $0x758] sm:$0xff]  ;;  %v607_v53 = vld [vmem:[%s2402_s1 + $0x7e0] sm:$0xff] }
  0x71   : > { %749 = vmatmul.f32.gmra.mxu0 %v327_v54  ;;  %807 = vmatmul.f32.gmra.mxu2 %v329_v55  ;;  %v558_v54 = vld [vmem:[%s2402_s1 + $0x658] sm:$0xff]  ;;  %v575_v55 = vld [vmem:[%s2402_s1 + $0x6e0] sm:$0xff] }
  0x72   : > { %909 = vmatpush.msra.mxu2 %v522_v56  ;;  %937 = vmatpush.msra.mxu3 %v539_v57  ;;  %v316_v56 = vld [vmem:[%s1689_s12 + $0xc8] sm:$0xff]  ;;  %v318_v57 = vld [vmem:[%s1689_s12 + $0xd8] sm:$0xff] }
  0x73   : > { %851 = vmatpush.msra.mxu0 %v490_v58  ;;  %879 = vmatpush.msra.mxu1 %v507_v59  ;;  %v589_v58 = vld [vmem:[%s2402_s1 + $0x750] sm:$0xff]  ;;  %v606_v59 = vld [vmem:[%s2402_s1 + $0x7d8] sm:$0xff] }
  0x74   : > { %778 = vmatmul.f32.gmra.mxu1 %v328_v60  ;;  %836 = vmatmul.f32.gmra.mxu3 %v330_v61  ;;  %v557_v60 = vld [vmem:[%s2402_s1 + $0x650] sm:$0xff]  ;;  %v574_v61 = vld [vmem:[%s2402_s1 + $0x6d8] sm:$0xff] }
  0x75   : > { %910 = vmatpush.msra.mxu2 %v521_v62  ;;  %938 = vmatpush.msra.mxu3 %v538_v63  ;;  %v588_v62 = vld [vmem:[%s2402_s1 + $0x748] sm:$0xff]  ;;  %v605_v63 = vld [vmem:[%s2402_s1 + $0x7d0] sm:$0xff] }
  0x76   : > { %852 = vmatpush.msra.mxu0 %v489_v0  ;;  %880 = vmatpush.msra.mxu1 %v506_v1  ;;  %v556_v0 = vld [vmem:[%s2402_s1 + $0x648] sm:$0xff]  ;;  %v573_v1 = vld [vmem:[%s2402_s1 + $0x6d0] sm:$0xff] }
  0x77   : > { %911 = vmatpush.msra.mxu2 %v520_v2  ;;  %939 = vmatpush.msra.mxu3 %v537_v3  ;;  %v587_v2 = vld [vmem:[%s2402_s1 + $0x740] sm:$0xff]  ;;  %v604_v3 = vld [vmem:[%s2402_s1 + $0x7c8] sm:$0xff] }
  0x78   : > { %853 = vmatpush.msra.mxu0 %v488_v4  ;;  %881 = vmatpush.msra.mxu1 %v505_v5  ;;  %v555_v4 = vld [vmem:[%s2402_s1 + $0x640] sm:$0xff]  ;;  %v572_v5 = vld [vmem:[%s2402_s1 + $0x6c8] sm:$0xff] }
  0x79   : > { %912 = vmatpush.msra.mxu2 %v519_v6  ;;  %940 = vmatpush.msra.mxu3 %v536_v7  ;;  %v331_v6 = vld [vmem:[%s1689_s12 + $0x140] sm:$0xff]  ;;  %v333_v7 = vld [vmem:[%s1689_s12 + $0x150] sm:$0xff] }
  0x7a   : > { %854 = vmatpush.msra.mxu0 %v487_v8  ;;  %882 = vmatpush.msra.mxu1 %v504_v9  ;;  %v586_v8 = vld [vmem:[%s2402_s1 + $0x738] sm:$0xff]  ;;  %v603_v9 = vld [vmem:[%s2402_s1 + $0x7c0] sm:$0xff] }
  0x7b   : > { %752 = vmatmul.f32.gmra.mxu0 %v343_v10  ;;  %810 = vmatmul.f32.gmra.mxu2 %v345_v11  ;;  %v554_v10 = vld [vmem:[%s2402_s1 + $0x638] sm:$0xff]  ;;  %v571_v11 = vld [vmem:[%s2402_s1 + $0x6c0] sm:$0xff] }
  0x7c   : > { %913 = vmatpush.msra.mxu2 %v518_v12  ;;  %941 = vmatpush.msra.mxu3 %v535_v13  ;;  %v332_v12 = vld [vmem:[%s1689_s12 + $0x148] sm:$0xff]  ;;  %v334_v13 = vld [vmem:[%s1689_s12 + $0x158] sm:$0xff] }
  0x7d   : > { %855 = vmatpush.msra.mxu0 %v486_v14  ;;  %883 = vmatpush.msra.mxu1 %v503_v15  ;;  %v585_v14 = vld [vmem:[%s2402_s1 + $0x730] sm:$0xff]  ;;  %v602_v15 = vld [vmem:[%s2402_s1 + $0x7b8] sm:$0xff] }
  0x7e   : > { %781 = vmatmul.f32.gmra.mxu1 %v344_v16  ;;  %839 = vmatmul.f32.gmra.mxu3 %v346_v17  ;;  %v553_v16 = vld [vmem:[%s2402_s1 + $0x630] sm:$0xff]  ;;  %v570_v17 = vld [vmem:[%s2402_s1 + $0x6b8] sm:$0xff] }
  0x7f   : > { %914 = vmatpush.msra.mxu2 %v517_v18  ;;  %942 = vmatpush.msra.mxu3 %v534_v19  ;;  %v584_v18 = vld [vmem:[%s2402_s1 + $0x728] sm:$0xff]  ;;  %v601_v19 = vld [vmem:[%s2402_s1 + $0x7b0] sm:$0xff] }
  0x80   : > { %856 = vmatpush.msra.mxu0 %v485_v20  ;;  %884 = vmatpush.msra.mxu1 %v502_v21  ;;  %v552_v20 = vld [vmem:[%s2402_s1 + $0x628] sm:$0xff]  ;;  %v569_v21 = vld [vmem:[%s2402_s1 + $0x6b0] sm:$0xff] }
  0x81   : > { %915 = vmatpush.msra.mxu2 %v516_v22  ;;  %943 = vmatpush.msra.mxu3 %v533_v23  ;;  %v583_v22 = vld [vmem:[%s2402_s1 + $0x720] sm:$0xff]  ;;  %v600_v23 = vld [vmem:[%s2402_s1 + $0x7a8] sm:$0xff] }
  0x82   : > { %857 = vmatpush.msra.mxu0 %v484_v24  ;;  %885 = vmatpush.msra.mxu1 %v501_v25  ;;  %v551_v24 = vld [vmem:[%s2402_s1 + $0x620] sm:$0xff]  ;;  %v568_v25 = vld [vmem:[%s2402_s1 + $0x6a8] sm:$0xff] }
  0x83   : > { %916 = vmatpush.msra.mxu2 %v515_v26  ;;  %944 = vmatpush.msra.mxu3 %v532_v27  ;;  %v347_v26 = vld [vmem:[%s1689_s12 + $0x1c0] sm:$0xff]  ;;  %v349_v27 = vld [vmem:[%s1689_s12 + $0x1d0] sm:$0xff] }
  0x84   : > { %858 = vmatpush.msra.mxu0 %v483_v28  ;;  %886 = vmatpush.msra.mxu1 %v500_v29  ;;  %v582_v28 = vld [vmem:[%s2402_s1 + $0x718] sm:$0xff]  ;;  %v599_v29 = vld [vmem:[%s2402_s1 + $0x7a0] sm:$0xff] }
  0x85   : > { %859 = vmatmul.f32.vlgmr.msra.gmra.mxu0 %v299_v30  ;;  %917 = vmatmul.f32.vlgmr.msra.gmra.mxu2 %v301_v31  ;;  %v550_v30 = vld [vmem:[%s2402_s1 + $0x618] sm:$0xff]  ;;  %v567_v31 = vld [vmem:[%s2402_s1 + $0x6a0] sm:$0xff] }
  0x86   : > { %945 = vmatpush.msra.mxu3 %v531_v32  ;;  %1017 = vmatpush.msrb.mxu2 %v594_v33  ;;  %v348_v32 = vld [vmem:[%s1689_s12 + $0x1c8] sm:$0xff]  ;;  %v350_v33 = vld [vmem:[%s1689_s12 + $0x1d8] sm:$0xff] }
  0x87   : > { %887 = vmatpush.msra.mxu1 %v499_v34  ;;  %959 = vmatpush.msrb.mxu0 %v562_v35  ;;  %v581_v34 = vld [vmem:[%s2402_s1 + $0x710] sm:$0xff]  ;;  %v598_v35 = vld [vmem:[%s2402_s1 + $0x798] sm:$0xff] }
  0x88   : > { %888 = vmatmul.f32.vlgmr.msra.gmra.mxu1 %v300_v36  ;;  %946 = vmatmul.f32.vlgmr.msra.gmra.mxu3 %v302_v37  ;;  %v549_v36 = vld [vmem:[%s2402_s1 + $0x610] sm:$0xff]  ;;  %v566_v37 = vld [vmem:[%s2402_s1 + $0x698] sm:$0xff] }
  0x89   : > { %1018 = vmatpush.msrb.mxu2 %v593_v38  ;;  %1046 = vmatpush.msrb.mxu3 %v610_v39  ;;  %v580_v38 = vld [vmem:[%s2402_s1 + $0x708] sm:$0xff]  ;;  %v597_v39 = vld [vmem:[%s2402_s1 + $0x790] sm:$0xff] }
  0x8a   : > { %960 = vmatpush.msrb.mxu0 %v561_v40  ;;  %988 = vmatpush.msrb.mxu1 %v578_v41  ;;  %v548_v40 = vld [vmem:[%s2402_s1 + $0x608] sm:$0xff]  ;;  %v565_v41 = vld [vmem:[%s2402_s1 + $0x690] sm:$0xff] }
  0x8b   : > { %1019 = vmatpush.msrb.mxu2 %v592_v42  ;;  %1047 = vmatpush.msrb.mxu3 %v609_v43  ;;  %v579_v42 = vld [vmem:[%s2402_s1 + $0x700] sm:$0xff]  ;;  %v596_v43 = vld [vmem:[%s2402_s1 + $0x788] sm:$0xff] }
  0x8c   : > { %961 = vmatpush.msrb.mxu0 %v560_v44  ;;  %989 = vmatpush.msrb.mxu1 %v577_v45  ;;  %v547_v44 = vld [vmem:[%s2402_s1 + $0x600] sm:$0xff]  ;;  %v564_v45 = vld [vmem:[%s2402_s1 + $0x688] sm:$0xff] }
  0x8d   : > { %1020 = vmatpush.msrb.mxu2 %v591_v46  ;;  %1048 = vmatpush.msrb.mxu3 %v608_v47  ;;  %v303_v46 = vld [vmem:[%s1689_s12 + $0x60] sm:$0xff]  ;;  %v305_v47 = vld [vmem:[%s1689_s12 + $0x70] sm:$0xff] }
  0x8e   : > { %962 = vmatpush.msrb.mxu0 %v559_v48  ;;  %990 = vmatpush.msrb.mxu1 %v576_v49  ;;  %v595_v48 = vld [vmem:[%s2402_s1 + $0x780] sm:$0xff] }
  0x8f   : > { %862 = vmatmul.f32.gmra.mxu0 %v315_v50  ;;  %920 = vmatmul.f32.gmra.mxu2 %v317_v51  ;;  %v563_v49 = vld [vmem:[%s2402_s1 + $0x680] sm:$0xff]  ;;  %v304_v50 = vld [vmem:[%s1689_s12 + $0x68] sm:$0xff]  ;;  %v306_v51 = vld [vmem:[%s1689_s12 + $0x78] sm:$0xff] }
  0x90   : > { %1021 = vmatpush.msrb.mxu2 %v590_v52  ;;  %1049 = vmatpush.msrb.mxu3 %v607_v53  ;;  %v319_v52 = vld [vmem:[%s1689_s12 + $0xe0] sm:$0xff]  ;;  %v321_v53 = vld [vmem:[%s1689_s12 + $0xf0] sm:$0xff] }
  0x91   : > { %963 = vmatpush.msrb.mxu0 %v558_v54  ;;  %991 = vmatpush.msrb.mxu1 %v575_v55  ;;  %v320_v55 = vld [vmem:[%s1689_s12 + $0xe8] sm:$0xff] }
  0x92   : > { %891 = vmatmul.f32.gmra.mxu1 %v316_v56  ;;  %949 = vmatmul.f32.gmra.mxu3 %v318_v57  ;;  %v322_v56 = vld [vmem:[%s1689_s12 + $0xf8] sm:$0xff] }
  0x93   : > { %1022 = vmatpush.msrb.mxu2 %v589_v58  ;;  %1050 = vmatpush.msrb.mxu3 %v606_v59 }
  0x94   : > { %964 = vmatpush.msrb.mxu0 %v557_v60  ;;  %992 = vmatpush.msrb.mxu1 %v574_v61  ;;  %v335_v61 = vld [vmem:[%s1689_s12 + $0x160] sm:$0xff] }
  0x95   : > { %1023 = vmatpush.msrb.mxu2 %v588_v62  ;;  %1051 = vmatpush.msrb.mxu3 %v605_v63  ;;  %v337_v62 = vld [vmem:[%s1689_s12 + $0x170] sm:$0xff] }
  0x96   : > { %965 = vmatpush.msrb.mxu0 %v556_v0  ;;  %993 = vmatpush.msrb.mxu1 %v573_v1  ;;  %v336_v0 = vld [vmem:[%s1689_s12 + $0x168] sm:$0xff]  ;;  %v338_v1 = vld [vmem:[%s1689_s12 + $0x178] sm:$0xff] }
  0x97   : > { %1024 = vmatpush.msrb.mxu2 %v587_v2  ;;  %1052 = vmatpush.msrb.mxu3 %v604_v3 }
  0x98   : > { %966 = vmatpush.msrb.mxu0 %v555_v4  ;;  %994 = vmatpush.msrb.mxu1 %v572_v5 }
  0x99   : > { %865 = vmatmul.f32.gmra.mxu0 %v331_v6  ;;  %923 = vmatmul.f32.gmra.mxu2 %v333_v7  ;;  %v351_v6 = vld [vmem:[%s1689_s12 + $0x1e0] sm:$0xff]  ;;  %v353_v7 = vld [vmem:[%s1689_s12 + $0x1f0] sm:$0xff] }
  0x9a   : > { %1025 = vmatpush.msrb.mxu2 %v586_v8  ;;  %1053 = vmatpush.msrb.mxu3 %v603_v9 }
  0x9b   : > { %967 = vmatpush.msrb.mxu0 %v554_v10  ;;  %995 = vmatpush.msrb.mxu1 %v571_v11  ;;  %v352_v10 = vld [vmem:[%s1689_s12 + $0x1e8] sm:$0xff]  ;;  %v354_v11 = vld [vmem:[%s1689_s12 + $0x1f8] sm:$0xff]  ;;  %s261_s12 = scalar_lea.vmem [#allocation3], %s1279_s10 }
  0x9c   : > { %894 = vmatmul.f32.gmra.mxu1 %v332_v12  ;;  %952 = vmatmul.f32.gmra.mxu3 %v334_v13  ;;  %s1162_s13 = sshll.u32 %s261_s12, 4  ;;  %s1163_s13 = int_to_ptr.vmem [resolvable:$true] %s1162_s13 }
  0x9d   : > { %1026 = vmatpush.msrb.mxu2 %v585_v14  ;;  %1054 = vmatpush.msrb.mxu3 %v602_v15 }
  0x9e   : > { %968 = vmatpush.msrb.mxu0 %v553_v16  ;;  %996 = vmatpush.msrb.mxu1 %v570_v17 }
  0x9f   : > { %1027 = vmatpush.msrb.mxu2 %v584_v18  ;;  %1055 = vmatpush.msrb.mxu3 %v601_v19 }
  0xa0   : > { %969 = vmatpush.msrb.mxu0 %v552_v20  ;;  %997 = vmatpush.msrb.mxu1 %v569_v21 }
  0xa1   : > { %1028 = vmatpush.msrb.mxu2 %v583_v22  ;;  %1056 = vmatpush.msrb.mxu3 %v600_v23 }
  0xa2   : > { %970 = vmatpush.msrb.mxu0 %v551_v24  ;;  %998 = vmatpush.msrb.mxu1 %v568_v25 }
  0xa3   : > { %868 = vmatmul.f32.gmra.mxu0 %v347_v26  ;;  %926 = vmatmul.f32.gmra.mxu2 %v349_v27 }
  0xa4   : > { %1029 = vmatpush.msrb.mxu2 %v582_v28  ;;  %1057 = vmatpush.msrb.mxu3 %v599_v29 }
  0xa5   : > { %971 = vmatpush.msrb.mxu0 %v550_v30  ;;  %999 = vmatpush.msrb.mxu1 %v567_v31 }
  0xa6   : > { %897 = vmatmul.f32.gmra.mxu1 %v348_v32  ;;  %955 = vmatmul.f32.gmra.mxu3 %v350_v33 }
  0xa7   : > { %1030 = vmatpush.msrb.mxu2 %v581_v34  ;;  %1058 = vmatpush.msrb.mxu3 %v598_v35 }
  0xa8   : > { %972 = vmatpush.msrb.mxu0 %v549_v36  ;;  %1000 = vmatpush.msrb.mxu1 %v566_v37 }
  0xa9   : > { %1031 = vmatpush.msrb.mxu2 %v580_v38  ;;  %1059 = vmatpush.msrb.mxu3 %v597_v39 }
  0xaa   : > { %973 = vmatpush.msrb.mxu0 %v548_v40  ;;  %1001 = vmatpush.msrb.mxu1 %v565_v41 }
  0xab   : > { %1032 = vmatpush.msrb.mxu2 %v579_v42  ;;  %1060 = vmatpush.msrb.mxu3 %v596_v43 }
  0xac   : > { %974 = vmatpush.msrb.mxu0 %v547_v44  ;;  %1002 = vmatpush.msrb.mxu1 %v564_v45 }
  0xad   : > { %975 = vmatmul.f32.vlgmr.msrb.gmra.mxu0 %v303_v46  ;;  %1033 = vmatmul.f32.vlgmr.msrb.gmra.mxu2 %v305_v47 }
  0xae   : > { %1061 = vmatpush.msrb.mxu3 %v595_v48  ;;  %1003 = vmatpush.msrb.mxu1 %v563_v49 }
  0xaf   : > { %1004 = vmatmul.f32.vlgmr.msrb.gmra.mxu1 %v304_v50  ;;  %1062 = vmatmul.f32.vlgmr.msrb.gmra.mxu3 %v306_v51 }
  0xb2   : > { %v628_v54 = vpop.f32.mrf.mxu0 }
  0xb5   : > { %978 = vmatmul.f32.gmra.mxu0 %v319_v52  ;;  %1036 = vmatmul.f32.gmra.mxu2 %v321_v53  ;;  %v657_v57 = vpop.f32.mrf.mxu1 }
  0xb6   : > { %v658_v58 = vadd.f32 %v657_v57, %v628_v54 }
  0xb7   : > { %1007 = vmatmul.f32.gmra.mxu1 %v320_v55  ;;  %1065 = vmatmul.f32.gmra.mxu3 %v322_v56 }
  0xb8   : > { %v686_v59 = vpop.f32.mrf.mxu2 }
  0xb9   : > { %v687_v60 = vadd.f32 %v686_v59, %v658_v58 }
  0xbb   : > { %v715_v63 = vpop.f32.mrf.mxu3 }
  0xbc   : > { %v631_v2 = vpop.f32.mrf.mxu0  ;;  %v716_v3 = vadd.f32 %v715_v63, %v687_v60 }
  0xbd   : > { %981 = vmatmul.f32.gmra.mxu0 %v335_v61  ;;  %1039 = vmatmul.f32.gmra.mxu2 %v337_v62 }
  0xbf   : > { %1010 = vmatmul.f32.gmra.mxu1 %v336_v0  ;;  %1068 = vmatmul.f32.gmra.mxu3 %v338_v1  ;;  %v660_v4 = vpop.f32.mrf.mxu1 }
  0xc0   : > { %v661_v5 = vadd.f32 %v660_v4, %v631_v2 }
  0xc2   : > { %v689_v8 = vpop.f32.mrf.mxu2 }
  0xc3   : > { %v690_v9 = vadd.f32 %v689_v8, %v661_v5 }
  0xc5   : > { %984 = vmatmul.f32.gmra.mxu0 %v351_v6  ;;  %1042 = vmatmul.f32.gmra.mxu2 %v353_v7  ;;  %v718_v12 = vpop.f32.mrf.mxu3 }
  0xc6   : > { %v634_v13 = vpop.f32.mrf.mxu0  ;;  %v719_v14 = vadd.f32 %v718_v12, %v690_v9 }
  0xc7   : > { %1013 = vmatmul.f32.gmra.mxu1 %v352_v10  ;;  %1071 = vmatmul.f32.gmra.mxu3 %v354_v11 }
  0xc9   : > { %v663_v15 = vpop.f32.mrf.mxu1 }
  0xca   : > { %v664_v16 = vadd.f32 %v663_v15, %v634_v13 }
  0xcc   : > { %v692_v17 = vpop.f32.mrf.mxu2 }
  0xcd   : > { %v693_v18 = vadd.f32 %v692_v17, %v664_v16 }
  0xcf   : > { %v721_v19 = vpop.f32.mrf.mxu3 }
  0xd0   : > { %v637_v20 = vpop.f32.mrf.mxu0  ;;  %v722_v21 = vadd.f32 %v721_v19, %v693_v18  ;;  %v1079_v19 = vld [vmem:[%s2403_s2 + $0x18] sm:$0xff] }
  0xd1   : > { %1128 = vmatpush.msra.mxu0 %v1079_v19 }
  0xd3   : > { %v666_v22 = vpop.f32.mrf.mxu1 }
  0xd4   : > { %v667_v23 = vadd.f32 %v666_v22, %v637_v20  ;;  %v1078_v20 = vld [vmem:[%s2403_s2 + $0x10] sm:$0xff] }
  0xd5   : > { %1129 = vmatpush.msra.mxu0 %v1078_v20 }
  0xd6   : > { %v695_v24 = vpop.f32.mrf.mxu2 }
  0xd7   : > { %v696_v25 = vadd.f32 %v695_v24, %v667_v23  ;;  %v1077_v24 = vld [vmem:[%s2403_s2 + $0x8] sm:$0xff] }
  0xd8   : > { %1130 = vmatpush.msra.mxu0 %v1077_v24 }
  0xd9   : > { %v724_v26 = vpop.f32.mrf.mxu3 }
  0xda   : > { %v725_v27 = vadd.f32 %v724_v26, %v696_v25  ;;  %v744_v28 = vpop.f32.mrf.mxu0 }
  0xdb   : > { %v745_v51 = vadd.f32 %v744_v28, %v716_v3 }
  0xdd   : > { %v773_v29 = vpop.f32.mrf.mxu1 }
  0xde   : > { %v774_v54 = vadd.f32 %v773_v29, %v745_v51  ;;  %v1076_v29 = vld [vmem:[%s2403_s2] sm:$0xff] }
  0xdf   : > { %1131 = vmatpush.msra.mxu0 %v1076_v29 }
  0xe0   : > { %v802_v30 = vpop.f32.mrf.mxu2 }
  0xe1   : > { %v803_v55 = vadd.f32 %v802_v30, %v774_v54 }
  0xe3   : > { %v831_v31 = vpop.f32.mrf.mxu3 }
  0xe4   : > { %v747_v32 = vpop.f32.mrf.mxu0  ;;  %v832_v59 = vadd.f32 %v831_v31, %v803_v55 }
  0xe5   : > { %v748_v57 = vadd.f32 %v747_v32, %v719_v14 }
  0xe7   : > { %v776_v33 = vpop.f32.mrf.mxu1 }
  0xe8   : > { %v777_v60 = vadd.f32 %v776_v33, %v748_v57 }
  0xea   : > { %v805_v34 = vpop.f32.mrf.mxu2 }
  0xeb   : > { %v806_v0 = vadd.f32 %v805_v34, %v777_v60 }
  0xed   : > { %v834_v35 = vpop.f32.mrf.mxu3 }
  0xee   : > { %v750_v36 = vpop.f32.mrf.mxu0  ;;  %v835_v5 = vadd.f32 %v834_v35, %v806_v0 }
  0xef   : > { %v751_v1 = vadd.f32 %v750_v36, %v722_v21 }
  0xf1   : > { %v779_v37 = vpop.f32.mrf.mxu1 }
  0xf2   : > { %v780_v3 = vadd.f32 %v779_v37, %v751_v1  ;;  %v1344_v1 = vld [vmem:[%s2404_s3] ss:$0 sm:$0xff] }
  0xf4   : > { %v808_v38 = vpop.f32.mrf.mxu2 }
  0xf5   : > { %v809_v9 = vadd.f32 %v808_v38, %v780_v3 }
  0xf7   : > { %v837_v39 = vpop.f32.mrf.mxu3 }
  0xf8   : > { %v753_v40 = vpop.f32.mrf.mxu0  ;;  %v838_v17 = vadd.f32 %v837_v39, %v809_v9 }
  0xf9   : > { %v754_v13 = vadd.f32 %v753_v40, %v725_v27 }
  0xfb   : > { %v782_v41 = vpop.f32.mrf.mxu1 }
  0xfc   : > { %v783_v21 = vadd.f32 %v782_v41, %v754_v13 }
  0xfe   : > { %v811_v42 = vpop.f32.mrf.mxu2 }
  0xff   : > { %v812_v26 = vadd.f32 %v811_v42, %v783_v21 }
 0x101   : > { %v840_v43 = vpop.f32.mrf.mxu3 }
 0x102   : > { %v860_v44 = vpop.f32.mrf.mxu0  ;;  %v841_v36 = vadd.f32 %v840_v43, %v812_v26 }
 0x103   : > { %v861_v61 = vadd.f32 %v860_v44, %v832_v59 }
 0x105   : > { %v889_v45 = vpop.f32.mrf.mxu1 }
 0x106   : > { %v890_v2 = vadd.f32 %v889_v45, %v861_v61 }
 0x108   : > { %v918_v46 = vpop.f32.mrf.mxu2 }
 0x109   : > { %v919_v6 = vadd.f32 %v918_v46, %v890_v2 }
 0x10b   : > { %v947_v47 = vpop.f32.mrf.mxu3 }
 0x10c   : > { %v863_v48 = vpop.f32.mrf.mxu0  ;;  %v948_v10 = vadd.f32 %v947_v47, %v919_v6 }
 0x10d   : > { %v864_v8 = vadd.f32 %v863_v48, %v835_v5 }
 0x10f   : > { %v892_v49 = vpop.f32.mrf.mxu1 }
 0x110   : > { %v893_v14 = vadd.f32 %v892_v49, %v864_v8 }
 0x112   : > { %v921_v50 = vpop.f32.mrf.mxu2 }
 0x113   : > { %v922_v18 = vadd.f32 %v921_v50, %v893_v14 }
 0x115   : > { %v950_v52 = vpop.f32.mrf.mxu3 }
 0x116   : > { %v866_v53 = vpop.f32.mrf.mxu0  ;;  %v951_v27 = vadd.f32 %v950_v52, %v922_v18 }
 0x117   : > { %v867_v22 = vadd.f32 %v866_v53, %v838_v17 }
 0x119   : > { %v895_v56 = vpop.f32.mrf.mxu1 }
 0x11a   : > { %v896_v32 = vadd.f32 %v895_v56, %v867_v22 }
 0x11c   : > { %v924_v58 = vpop.f32.mrf.mxu2 }
 0x11d   : > { %v925_v37 = vadd.f32 %v924_v58, %v896_v32 }
 0x11f   : > { %v953_v62 = vpop.f32.mrf.mxu3 }
 0x120   : > { %v869_v63 = vpop.f32.mrf.mxu0  ;;  %v954_v41 = vadd.f32 %v953_v62, %v925_v37 }
 0x121   : > { %v870_v38 = vadd.f32 %v869_v63, %v841_v36 }
 0x123   : > { %v898_v4 = vpop.f32.mrf.mxu1 }
 0x124   : > { %v899_v46 = vadd.f32 %v898_v4, %v870_v38 }
 0x126   : > { %v927_v7 = vpop.f32.mrf.mxu2 }
 0x127   : > { %v928_v50 = vadd.f32 %v927_v7, %v899_v46 }
 0x129   : > { %v956_v11 = vpop.f32.mrf.mxu3 }
 0x12a   : > { %v976_v12 = vpop.f32.mrf.mxu0  ;;  %v957_v53 = vadd.f32 %v956_v11, %v928_v50 }
 0x12b   : > { %v977_v15 = vadd.f32 %v976_v12, %v948_v10 }
 0x12c   : > { %v1005_v16 = vpop.f32.mrf.mxu1 }
 0x12d   : > { %v1006_v23 = vadd.f32 %v1005_v16, %v977_v15 }
 0x130   : > { %v1034_v25 = vpop.f32.mrf.mxu2 }
 0x131   : > { %v1035_v28 = vadd.f32 %v1034_v25, %v1006_v23 }
 0x132   : > { %v979_v30 = vpop.f32.mrf.mxu0  ;;  %v1063_v31 = vpop.f32.mrf.mxu3 }
 0x133   : > { %v980_v33 = vadd.f32 %v979_v30, %v951_v27  ;;  %v1064_v34 = vadd.f32 %v1063_v31, %v1035_v28 }
 0x134   : > { %v1008_v35 = vpop.f32.mrf.mxu1 }
 0x135   : > { %1080 = vxpose.xlu0.b32.start [1/4] (short) (narrow) %v1064_v34, 8  ;;  %v1009_v39 = vadd.f32 %v1008_v35, %v980_v33 }
 0x138   : > { %v1037_v40 = vpop.f32.mrf.mxu2 }
 0x139   : > { %v1038_v42 = vadd.f32 %v1037_v40, %v1009_v39 }
 0x13a   : > { %v982_v44 = vpop.f32.mrf.mxu0  ;;  %v1066_v45 = vpop.f32.mrf.mxu3 }
 0x13b   : > { %v983_v47 = vadd.f32 %v982_v44, %v954_v41  ;;  %v1067_v48 = vadd.f32 %v1066_v45, %v1038_v42 }
 0x13c   : > { %v1011_v49 = vpop.f32.mrf.mxu1 }
 0x13d   : > { %1081 = vxpose.xlu0.b32.cont [2/4] (short) (narrow) %v1067_v48, 8  ;;  %v1012_v51 = vadd.f32 %v1011_v49, %v983_v47 }
 0x140   : > { %v1040_v52 = vpop.f32.mrf.mxu2 }
 0x141   : > { %v1041_v54 = vadd.f32 %v1040_v52, %v1012_v51 }
 0x142   : > { %v985_v43 = vpop.f32.mrf.mxu0  ;;  %v1069_v55 = vpop.f32.mrf.mxu3 }
 0x143   : > { %v986_v56 = vadd.f32 %v985_v43, %v957_v53  ;;  %v1070_v57 = vadd.f32 %v1069_v55, %v1041_v54 }
 0x144   : > { %v1014_v58 = vpop.f32.mrf.mxu1 }
 0x145   : > { %1082 = vxpose.xlu0.b32.cont [3/4] (short) (narrow) %v1070_v57, 8  ;;  %v1015_v59 = vadd.f32 %v1014_v58, %v986_v56 }
 0x148   : > { %v1043_v60 = vpop.f32.mrf.mxu2 }
 0x149   : > { %v1044_v61 = vadd.f32 %v1043_v60, %v1015_v59 }
 0x14a   : > { %v1072_v62 = vpop.f32.mrf.mxu3 }
 0x14b   : > { %v1073_v63 = vadd.f32 %v1072_v62, %v1044_v61 }
 0x14d   : > { %1083 = vxpose.xlu0.b32.end [4/4] (short) (narrow) %v1073_v63, 8 }
 0x1d9   : > { %v1096_v0 = vpop.trf.xlu0 }
 0x1da   : > { %1282 = vmatmul.msk.f32.vlgmr.msra.gmra.mxu0 %vm1112_vm0, %v1096_v0 }
 0x257   : > { %v1133_v2 = vpop.f32.mrf.mxu0 }
 0x258   : > { %v1146_v4 = vadd.f32 %v1344_v1, %v1133_v2 }
 0x25a   : > { %1147 = vst [vmem:[%s261_s12] sm:$0xff] %v1146_v4 }
 0x25b   : > { %1372 = shalt.err (!%p1369_p5)
}
 0x25c   : > { %1288 = dma.vmem_to_hbm [thread:$0]  (%p1490_p4), %s1163_s13, 128, %s1165_s30, %s1149_s5  }
 0x25d PF: > { %p1294_p6 = scmp.ge.s32.totalorder %s1423_s20, 2  ;;  %s1176_s9 = sand.u32 1, %s1403_s15  }
 0x25e   : > { %s1177_s21 = scalar_lea.sflag [#allocation4], %s1176_s9 }
 0x25f   : > { %p1291_p7 = pnand %p1294_p6, %p1497_p8 }
 0x261   : > { %p1292_p9 = pneg %p1291_p7 }
 0x263   : > { %1398 = dma.done.wait (%p1292_p9), %s1177_s21, 128  }
 0x264   : > { %1400 = vsyncadd (%p1292_p9), %s1177_s21, 4294967168  ;;  %s17_s20 = sadd.s32 1, %s1423_s20   ;;  %s2408_s15 = smov %s1407_s16 }
 0x265   : > { %p14_p10 = scmp.ge.s32.totalorder %s17_s20, 6   ;;  %s2409_s16 = smov %s1411_s17 }
 0x266   : > { %s2410_s17 = smov %s1503_s28  ;;  %s2411_s18 = smov %s1419_s19 }
 0x267   : > { %s2412_s19 = smov %s2414_s23  ;;  %16 = sbr.rel (!%p14_p10) target bundleno = 4 (0x4), region = 85 }
 0x26c   :  { %1183 = vsyncpa [#allocation4], 1 }
 0x26d   :  { %1185 = vsyncpa [#allocation4 + $0x1], 1 }

</bundles_post_ra>
